<compile_context>
chip_gen: v6e
topology: v6e:2x2x1
jax: 0.10.0
libtpu: 0.0.40
codegen_flags: <defaults>
</compile_context>

<pallas_src>
import functools
from typing import NamedTuple

import jax
import jax.numpy as jnp
from jax import lax
from jax.experimental import pallas as pl
from jax.experimental.pallas import tpu as pltpu


_LANE_MULTIPLE = 256   # align feature dims to the 256x256 MXU (v6e/v7x); also valid on v5e
_SUBLANE = 8


def _round_up(n: int, m: int) -> int:
    return ((n + m - 1) // m) * m


def _vmem_capacity_bytes() -> int:
    """Physical per-core VMEM; conservative 64 MiB (v7x) fallback if the query fails."""
    try:
        return int(pltpu.get_tpu_info().vmem_capacity_bytes)
    except Exception:  # hardware query only -- never masks a kernel error
        return 64 << 20


def _gelu(h, approximate: bool):
    if approximate:
        # tanh approximation: transcendental goes to the EUP slot instead of a long
        # erf polynomial on the VALU.  Matches torch.nn.GELU(approximate="tanh").
        c = 0.7978845608028654  # sqrt(2/pi)
        return 0.5 * h * (1.0 + jnp.tanh(c * (h + 0.044715 * (h * h * h))))
    # exact erf: matches torch nn.GELU() default
    return 0.5 * h * (1.0 + lax.erf(h * 0.7071067811865476))


# ---------------------------------------------------------------------------
# Kernels
# ---------------------------------------------------------------------------

def _ffn_resident_kernel(x_ref, w1_ref, b1_ref, w2_ref, b2_ref, o_ref, *,
                         compute_dtype, approximate_gelu):
    # x_ref: (tm, D_p) | w1_ref: (D_p, H_p) | b1_ref: (1, H_p) f32
    # w2_ref: (H_p, D_p) | b2_ref: (1, D_p) f32 | o_ref: (tm, D_p)
    x = x_ref[...].astype(compute_dtype)
    h = jnp.dot(x, w1_ref[...], preferred_element_type=jnp.float32)
    h = h + b1_ref[...]
    h = _gelu(h, approximate_gelu)
    o = jnp.dot(h.astype(compute_dtype), w2_ref[...],
                preferred_element_type=jnp.float32)
    o = o + b2_ref[...]
    o_ref[...] = o.astype(o_ref.dtype)


def _ffn_htiled_kernel(x_ref, w1_ref, b1_ref, w2_ref, b2_ref, o_ref, acc_ref, *,
                       compute_dtype, approximate_gelu):
    # Grid: (M tiles, H tiles).  W1/W2 panels stream over the H ("arbitrary") axis;
    # acc_ref is a (tm, D_p) f32 accumulator that lives across H steps.
    j = pl.program_id(1)

    @pl.when(j == 0)
    def _():
        acc_ref[...] = jnp.zeros_like(acc_ref)

    x = x_ref[...].astype(compute_dtype)
    h = jnp.dot(x, w1_ref[...], preferred_element_type=jnp.float32)
    h = h + b1_ref[...]
    h = _gelu(h, approximate_gelu)
    acc_ref[...] += jnp.dot(h.astype(compute_dtype), w2_ref[...],
                            preferred_element_type=jnp.float32)

    @pl.when(j == pl.num_programs(1) - 1)
    def _():
        o_ref[...] = (acc_ref[...] + b2_ref[...]).astype(o_ref.dtype)


# ---------------------------------------------------------------------------
# pallas_call wrapper
# ---------------------------------------------------------------------------

@functools.partial(jax.jit,
                   static_argnames=("tm", "th", "resident", "approximate_gelu"))
def _ffn_pallas(x2, w1, b1_2d, w2, b2_2d, *, tm, th, resident, approximate_gelu):
    M, D = x2.shape
    H = w1.shape[1]
    wsize = w1.dtype.itemsize
    xsize = x2.dtype.itemsize
    compute_dtype = w1.dtype  # bf16 (MXU fast path) or f32; f32 accumulation either way

    # Generation-aware VMEM budget (~54 MiB on v7x, ~108 MiB on v5e/v6e).
    budget = int(_vmem_capacity_bytes() * 0.85)
    w_panel = (D * H + H * D) if resident else (D * th + th * D)
    weight_buf = 2 * w_panel * wsize + 2 * (H + D) * 4          # double-buffered
    io_buf = 2 * 2 * tm * D * xsize                             # x + out, 2 buffers each
    interm = tm * (H if resident else th) * 4 + tm * D * 4      # f32 h + o temporaries
    acc = 0 if resident else tm * D * 4                         # accumulator scratch
    need = int((weight_buf + io_buf + interm + acc) * 1.3) + (2 << 20)
    vmem_limit = max(32 << 20, min(budget, need))

    cost = pl.CostEstimate(
        flops=4 * M * D * H,                 # two matmuls, 2*M*D*H each
        transcendentals=M * H,               # one tanh/erf per hidden element
        bytes_accessed=xsize * 2 * M * D + wsize * 2 * D * H + 4 * (H + D),
    )

    if resident:
        grid = (pl.cdiv(M, tm),)
        in_specs = [
            pl.BlockSpec((tm, D), lambda i: (i, 0)),     # x rows (streamed)
            pl.BlockSpec((D, H), lambda i: (0, 0)),      # W1 (resident)
            pl.BlockSpec((1, H), lambda i: (0, 0)),      # b1 (resident, f32)
            pl.BlockSpec((H, D), lambda i: (0, 0)),      # W2 (resident)
            pl.BlockSpec((1, D), lambda i: (0, 0)),      # b2 (resident, f32)
        ]
        out_specs = pl.BlockSpec((tm, D), lambda i: (i, 0))
        scratch_shapes = []
        dims = ("parallel",)
        kernel = functools.partial(_ffn_resident_kernel,
                                   compute_dtype=compute_dtype,
                                   approximate_gelu=approximate_gelu)
    else:
        grid = (pl.cdiv(M, tm), pl.cdiv(H, th))
        in_specs = [
            pl.BlockSpec((tm, D), lambda i, j: (i, 0)),  # x rows
            pl.BlockSpec((D, th), lambda i, j: (0, j)),  # W1 column panel
            pl.BlockSpec((1, th), lambda i, j: (0, j)),  # b1 slice
            pl.BlockSpec((th, D), lambda i, j: (j, 0)),  # W2 row panel
            pl.BlockSpec((1, D), lambda i, j: (0, 0)),   # b2
        ]
        out_specs = pl.BlockSpec((tm, D), lambda i, j: (i, 0))
        scratch_shapes = [pltpu.VMEM((tm, D), jnp.float32)]
        dims = ("parallel", "arbitrary")
        kernel = functools.partial(_ffn_htiled_kernel,
                                   compute_dtype=compute_dtype,
                                   approximate_gelu=approximate_gelu)

    return pl.pallas_call(
        kernel,
        out_shape=jax.ShapeDtypeStruct((M, D), x2.dtype),
        grid_spec=pltpu.PrefetchScalarGridSpec(
            num_scalar_prefetch=0,
            grid=grid,
            in_specs=in_specs,
            out_specs=out_specs,
            scratch_shapes=scratch_shapes,
        ),
        compiler_params=pltpu.CompilerParams(
            dimension_semantics=dims,          # M axis "parallel": v7x splits it over 2 TCs
            vmem_limit_bytes=vmem_limit,
        ),
        cost_estimate=cost,
    )(x2, w1, b1_2d, w2, b2_2d)


# ---------------------------------------------------------------------------
# Parameter preparation (one-time) and forward
# ---------------------------------------------------------------------------

class FFNParams(NamedTuple):
    w1: jax.Array    # (D_p, H_p), compute dtype (bf16 by default)
    b1: jax.Array    # (1, H_p), f32
    w2: jax.Array    # (H_p, D_p), compute dtype
    b2: jax.Array    # (1, D_p), f32
    dim: int         # original D
    hidden_dim: int  # original H


def prepare_ffn_params(w1, b1, w2, b2, *, weights_dtype=jnp.bfloat16) -> FFNParams:
    """Pad feature dims to 256 and cast weights ONCE (hoisted out of the forward pass).

    Weights are stored pre-transposed for y = x @ w + b (PyTorch nn.Linear keeps [out, in]).
    Zero padding is numerically exact (GELU(0)=0, padded bias is zero).
    """
    D, H = w1.shape
    D_p = _round_up(D, _LANE_MULTIPLE)
    H_p = _round_up(H, _LANE_MULTIPLE)
    w1p = jnp.pad(w1, ((0, D_p - D), (0, H_p - H))).astype(weights_dtype)
    w2p = jnp.pad(w2, ((0, H_p - H), (0, D_p - D))).astype(weights_dtype)
    b1p = jnp.pad(b1.astype(jnp.float32), ((0, H_p - H),)).reshape(1, H_p)
    b2p = jnp.pad(b2.astype(jnp.float32), ((0, D_p - D),)).reshape(1, D_p)
    return FFNParams(w1p, b1p, w2p, b2p, D, H)


def ffn_forward(x, params: FFNParams, *, tm=512, th=512,
                approximate_gelu=True, force_h_tiling=False):
    """x: [B, S, D].  Returns [B, S, D]."""
    B, S, D = x.shape
    assert D == params.dim, (D, params.dim)
    M = B * S
    D_p, H_p = params.w1.shape

    x2 = x.reshape(M, D)
    if D_p != D:
        x2 = jnp.pad(x2, ((0, 0), (0, D_p - D)))

    # Row tile: whole M for small inputs (block == full dim is always legal),
    # otherwise a multiple of the 8-sublane granularity (default 512).
    tm_eff = M if M <= tm else _round_up(tm, _SUBLANE)
    th_eff = min(_round_up(th, 128), H_p)

    # Resident vs. H-tiled decision against the generation-aware VMEM budget.
    budget = int(_vmem_capacity_bytes() * 0.85)
    wsize = params.w1.dtype.itemsize
    resident_need = int((2 * 2 * D_p * H_p * wsize              # W1 + W2, double-buffered
                         + 2 * (H_p + D_p) * 4                  # biases
                         + 2 * 2 * tm_eff * D_p * x2.dtype.itemsize
                         + tm_eff * H_p * 4 + tm_eff * D_p * 4) * 1.3) + (2 << 20)
    resident = (not force_h_tiling) and (resident_need <= budget)

    out2 = _ffn_pallas(x2, params.w1, params.b1, params.w2, params.b2,
                       tm=tm_eff, th=th_eff, resident=resident,
                       approximate_gelu=approximate_gelu)

    if D_p != D:
        out2 = out2[:, :D]
    return out2.reshape(B, S, D)


def ffn_reference(x, w1, b1, w2, b2):
    h = jnp.dot(x, w1) + b1
    h = jax.nn.gelu(h, approximate=False)   # torch nn.GELU() default (exact erf)
    return jnp.dot(h, w2) + b2


if __name__ == "__main__":
    # Small shapes consistent with the module: tokens [B, S, dim], hidden = 2*dim.
    B, S, dim, hidden_dim = 2, 8, 32, 64

    key = jax.random.PRNGKey(0)
    kx, k1, k2, k3, k4 = jax.random.split(key, 5)

    x = jax.random.normal(kx, (B, S, dim), dtype=jnp.float32)
    w1 = jax.random.normal(k1, (dim, hidden_dim), dtype=jnp.float32) * 0.05
    b1 = jax.random.normal(k2, (hidden_dim,), dtype=jnp.float32) * 0.05
    w2 = jax.random.normal(k3, (hidden_dim, dim), dtype=jnp.float32) * 0.05
    b2 = jax.random.normal(k4, (dim,), dtype=jnp.float32) * 0.05

    ref = ffn_reference(x, w1, b1, w2, b2)

    # 1) exact-numerics config (f32 weights + exact erf GELU), matches torch defaults.
    params_f32 = prepare_ffn_params(w1, b1, w2, b2, weights_dtype=jnp.float32)
    out_exact = jax.block_until_ready(
        ffn_forward(x, params_f32, approximate_gelu=False))
    assert out_exact.shape == (B, S, dim), out_exact.shape
    assert jnp.allclose(out_exact, ref, atol=1e-5, rtol=1e-5), float(
        jnp.max(jnp.abs(out_exact - ref)))

    # 2) performance config (bf16 weights on the MXU fast path, tanh GELU, f32 accum).
    params_bf16 = prepare_ffn_params(w1, b1, w2, b2)
    out_fast = jax.block_until_ready(ffn_forward(x, params_bf16))
    assert out_fast.shape == (B, S, dim), out_fast.shape
    assert jnp.allclose(out_fast, ref, atol=2e-2, rtol=2e-2), float(
        jnp.max(jnp.abs(out_fast - ref)))

    # 3) H-tiled streaming path (selected automatically when weights exceed the
    #    VMEM budget; forced here with a small H tile to exercise the accumulator).
    out_ht = jax.block_until_ready(
        ffn_forward(x, params_bf16, th=128, force_h_tiling=True))
    assert jnp.allclose(out_ht, ref, atol=2e-2, rtol=2e-2), float(
        jnp.max(jnp.abs(out_ht - ref)))

    print("KERNEL_OK")
</pallas_src>

<mosaic_0001>
module attributes {stable_mosaic.version = 11 : i64} {
  func.func @_ffn_resident_kernel(%arg0: i32, %arg1: memref<16x256xf32, #tpu.memory_space<vmem>>, %arg2: memref<256x256xf32, #tpu.memory_space<vmem>>, %arg3: memref<1x256xf32, #tpu.memory_space<vmem>>, %arg4: memref<256x256xf32, #tpu.memory_space<vmem>>, %arg5: memref<1x256xf32, #tpu.memory_space<vmem>>, %arg6: memref<16x256xf32, #tpu.memory_space<vmem>>) attributes {dimension_semantics = [#tpu.dimension_semantics<parallel>], iteration_bounds = array<i64: 1>, scalar_prefetch = 0 : i64, scratch_operands = 0 : i64, tpu.core_type = #tpu.core_type<tc>, window_params = [{transform_indices = @transform_0, window_bounds = array<i64: 16, 256>}, {pipeline_mode = #tpu.pipeline_mode<synchronous>, transform_indices = @transform_1, window_bounds = array<i64: 256, 256>}, {pipeline_mode = #tpu.pipeline_mode<synchronous>, transform_indices = @transform_2, window_bounds = array<i64: 1, 256>}, {pipeline_mode = #tpu.pipeline_mode<synchronous>, transform_indices = @transform_3, window_bounds = array<i64: 256, 256>}, {pipeline_mode = #tpu.pipeline_mode<synchronous>, transform_indices = @transform_4, window_bounds = array<i64: 1, 256>}, {transform_indices = @transform_5, window_bounds = array<i64: 16, 256>}]} {
    %c0 = arith.constant 0 : index
    %c0_0 = arith.constant 0 : index
    %0 = vector.load %arg1[%c0, %c0_0] : memref<16x256xf32, #tpu.memory_space<vmem>>, vector<16x256xf32>
    %c0_1 = arith.constant 0 : index
    %c0_2 = arith.constant 0 : index
    %1 = vector.load %arg2[%c0_1, %c0_2] : memref<256x256xf32, #tpu.memory_space<vmem>>, vector<256x256xf32>
    %cst = arith.constant dense<0.000000e+00> : vector<16x256xf32>
    %2 = tpu.matmul %0, %1, %cst {dimension_numbers = #tpu.dot_dimension_numbers<[1], [0], [0], [1], [0, 0, 1, 1], [], []>} : vector<16x256xf32>, vector<256x256xf32>, vector<16x256xf32> -> vector<16x256xf32>
    %c0_3 = arith.constant 0 : index
    %c0_4 = arith.constant 0 : index
    %3 = vector.load %arg3[%c0_3, %c0_4] : memref<1x256xf32, #tpu.memory_space<vmem>>, vector<1x256xf32>
    %4 = vector.broadcast %3 : vector<1x256xf32> to vector<16x256xf32>
    %5 = arith.addf %2, %4 : vector<16x256xf32>
    %cst_5 = arith.constant 5.000000e-01 : f32
    %6 = vector.broadcast %cst_5 : f32 to vector<16x256xf32>
    %7 = arith.mulf %6, %5 : vector<16x256xf32>
    %cst_6 = arith.constant 0.707106769 : f32
    %8 = vector.broadcast %cst_6 : f32 to vector<16x256xf32>
    %9 = arith.mulf %5, %8 : vector<16x256xf32>
    %10 = math.erf %9 : vector<16x256xf32>
    %cst_7 = arith.constant 1.000000e+00 : f32
    %11 = vector.broadcast %cst_7 : f32 to vector<16x256xf32>
    %12 = arith.addf %11, %10 : vector<16x256xf32>
    %13 = arith.mulf %7, %12 : vector<16x256xf32>
    %c0_8 = arith.constant 0 : index
    %c0_9 = arith.constant 0 : index
    %14 = vector.load %arg4[%c0_8, %c0_9] : memref<256x256xf32, #tpu.memory_space<vmem>>, vector<256x256xf32>
    %cst_10 = arith.constant dense<0.000000e+00> : vector<16x256xf32>
    %15 = tpu.matmul %13, %14, %cst_10 {dimension_numbers = #tpu.dot_dimension_numbers<[1], [0], [0], [1], [0, 0, 1, 1], [], []>} : vector<16x256xf32>, vector<256x256xf32>, vector<16x256xf32> -> vector<16x256xf32>
    %c0_11 = arith.constant 0 : index
    %c0_12 = arith.constant 0 : index
    %16 = vector.load %arg5[%c0_11, %c0_12] : memref<1x256xf32, #tpu.memory_space<vmem>>, vector<1x256xf32>
    %17 = vector.broadcast %16 : vector<1x256xf32> to vector<16x256xf32>
    %18 = arith.addf %15, %17 : vector<16x256xf32>
    %c0_13 = arith.constant 0 : index
    %c0_14 = arith.constant 0 : index
    %19 = vector.load %arg6[%c0_13, %c0_14] : memref<16x256xf32, #tpu.memory_space<vmem>>, vector<16x256xf32>
    tpu.vector_store %arg6[%c0_13, %c0_14], %18 {strides = array<i32>} : memref<16x256xf32, #tpu.memory_space<vmem>>, vector<16x256xf32>,
    return
  }
  func.func @transform_0(%arg0: i32) -> (i32, i32) {
    %c0_i32 = arith.constant 0 : i32
    %c0_i32_0 = arith.constant 0 : i32
    return %arg0, %c0_i32 : i32, i32
  }
  func.func @transform_1(%arg0: i32) -> (i32, i32) {
    %c0_i32 = arith.constant 0 : i32
    %c0_i32_0 = arith.constant 0 : i32
    %c0_i32_1 = arith.constant 0 : i32
    return %c0_i32, %c0_i32_0 : i32, i32
  }
  func.func @transform_2(%arg0: i32) -> (i32, i32) {
    %c0_i32 = arith.constant 0 : i32
    %c0_i32_0 = arith.constant 0 : i32
    %c0_i32_1 = arith.constant 0 : i32
    return %c0_i32, %c0_i32_0 : i32, i32
  }
  func.func @transform_3(%arg0: i32) -> (i32, i32) {
    %c0_i32 = arith.constant 0 : i32
    %c0_i32_0 = arith.constant 0 : i32
    %c0_i32_1 = arith.constant 0 : i32
    return %c0_i32, %c0_i32_0 : i32, i32
  }
  func.func @transform_4(%arg0: i32) -> (i32, i32) {
    %c0_i32 = arith.constant 0 : i32
    %c0_i32_0 = arith.constant 0 : i32
    %c0_i32_1 = arith.constant 0 : i32
    return %c0_i32, %c0_i32_0 : i32, i32
  }
  func.func @transform_5(%arg0: i32) -> (i32, i32) {
    %c0_i32 = arith.constant 0 : i32
    %c0_i32_0 = arith.constant 0 : i32
    return %arg0, %c0_i32 : i32, i32
  }
}

</mosaic_0001>

<bundles_post_ra>
// kernel: _ffn_pallas.1
= control target key start
LH: loop header
LB: loop body
LE: loop exit
PB: predicated region body
PF: predicated region fallthrough
CT: control target
= control target key end

     0   :  { %10 = vsyncpa [#allocation3], 0  ;;  %s580_s0 = inlined_call_operand.hbm [shape: f32[16,256], index: 0, kind: input, shape index: {}]   ;;  %s581_s1 = inlined_call_operand.hbm [shape: f32[256,256], index: 1, kind: input, shape index: {}]   ;;  %s582_s2 = inlined_call_operand.vmem [shape: f32[1,256], index: 2, kind: input, shape index: {}]   ;;  %s583_s3 = inlined_call_operand.hbm [shape: f32[256,256], index: 3, kind: input, shape index: {}]   ;;  %s584_s4 = inlined_call_operand.vmem [shape: f32[1,256], index: 4, kind: input, shape index: {}]   ;;  %s585_s5 = inlined_call_operand.hbm [shape: f32[16,256], index: 5, kind: output, shape index: {}]  }
   0x1   :  { %11 = vsyncpa [#allocation6], 0 }
   0x2   :  { %12 = vsyncpa [#allocation4], 0  ;;  %s514_s18 = smov [#allocation5]   ;;  %s515_s20 = smov [#allocation2]  }
   0x3   :  { %s30_s19 = sshll.u32 %s514_s18, 4  ;;  %s18_s21 = sshll.u32 %s515_s20, 4  ;;  %s31_s19 = int_to_ptr.vmem [resolvable:$true] %s30_s19  ;;  %s19_s21 = int_to_ptr.vmem [resolvable:$true] %s18_s21 }
   0x4   :  { %s436_s22 = scalar_lea.vmem %s31_s19, 8192  ;;  %p441_p1 = scmp.lt.s32.totalorder %s31_s19, %s31_s19 }
   0x5   :  { %p437_p0 = scmp.ne.s32.totalorder %s31_s19, %s436_s22  ;;  %p442_p2 = scmp.lt.s32.totalorder %s436_s22, %s436_s22 }
   0x7   :  { %p443_p3 = por %p442_p2, %p441_p1 }
   0x9   :  { %p444_p4 = pnand %p443_p3, %p437_p0 }
   0xb   :  { %447 = shalt.err (!%p444_p4)
}
   0xc   :  { %s516_s23 = smov 256   ;;  %s517_s24 = smov 16  }
   0xd   :  { %36 = dma.hbm_to_vmem [thread:$0]  %s581_s1, 8192, %s31_s19, [#allocation6], %s516_s23, %s516_s23, %s517_s24  }
   0xe   :  { %s456_s27 = scalar_lea.vmem %s19_s21, 512  ;;  %p461_p6 = scmp.lt.s32.totalorder %s19_s21, %s19_s21 }
   0xf   :  { %p457_p5 = scmp.ne.s32.totalorder %s19_s21, %s456_s27  ;;  %p462_p7 = scmp.lt.s32.totalorder %s456_s27, %s456_s27 }
  0x11   :  { %p463_p8 = por %p462_p7, %p461_p6 }
  0x13   :  { %p464_p9 = pnand %p463_p8, %p457_p5 }
  0x15   :  { %467 = shalt.err (!%p464_p9)
}
  0x16   :  { %24 = dma.hbm_to_vmem [thread:$0]  %s580_s0, 512, %s19_s21, [#allocation3], %s516_s23, %s516_s23, %s517_s24  }
  0x17   :  { %s518_s30 = smov [#allocation7]  }
  0x18   :  { %s44_s6 = sshll.u32 %s518_s30, 4  ;;  %s45_s6 = int_to_ptr.vmem [resolvable:$true] %s44_s6 }
  0x19   :  { %s476_s7 = scalar_lea.vmem %s45_s6, 8192  ;;  %p481_p11 = scmp.lt.s32.totalorder %s45_s6, %s45_s6 }
  0x1a   :  { %p477_p10 = scmp.ne.s32.totalorder %s45_s6, %s476_s7  ;;  %p482_p12 = scmp.lt.s32.totalorder %s476_s7, %s476_s7 }
  0x1c   :  { %p483_p13 = por %p482_p12, %p481_p11 }
  0x1e   :  { %p484_p0 = pnand %p483_p13, %p477_p10 }
  0x20   :  { %487 = shalt.err (!%p484_p0)
}
  0x21   :  { %50 = dma.hbm_to_vmem [thread:$0]  %s583_s3, 8192, %s45_s6, [#allocation6], %s516_s23, %s516_s23, %s517_s24  }
  0x22   :  { %508 = dma.done.wait [#allocation3], 512  }
  0x23   :  { %509 = vsyncadd [#allocation3], 4294966784 }
  0x24   :  { %510 = dma.done.wait [#allocation6], 16384  }
  0x25   :  { %511 = vsyncadd [#allocation6], 4294950912  ;;  %v97_v0 = vld [vmem:[#allocation5 + $0xf8] sm:$0xff]  ;;  %v96_v1 = vld [vmem:[#allocation5 + $0xf0] sm:$0xff]  ;;  %s519_s10 = smov [#allocation8]  }
  0x26   :  { %v95_v2 = vld [vmem:[#allocation5 + $0xe8] sm:$0xff]  ;;  %142 = vmatprep.subr.mxu0 %v97_v0  ;;  %v94_v3 = vld [vmem:[#allocation5 + $0xe0] sm:$0xff]  ;;  %v93_v4 = vld [vmem:[#allocation5 + $0xd8] sm:$0xff]  ;;  %s401_s11 = sshll.u32 %s519_s10, 4  ;;  %s402_s11 = int_to_ptr.vmem [resolvable:$true] %s401_s11 }
  0x27   :  { %143 = vmatpush1.msra.mxu0 %v96_v1  ;;  %v92_v5 = vld [vmem:[#allocation5 + $0xd0] sm:$0xff]  ;;  %v91_v6 = vld [vmem:[#allocation5 + $0xc8] sm:$0xff]  ;;  %v90_v7 = vld [vmem:[#allocation5 + $0xc0] sm:$0xff]  ;;  %s488_s12 = scalar_lea.vmem %s402_s11, 512  ;;  %p493_p2 = scmp.lt.s32.totalorder %s402_s11, %s402_s11 }
  0x28   :  { %144 = vmatprep.subr.mxu0 %v95_v2  ;;  %v89_v8 = vld [vmem:[#allocation5 + $0xb8] sm:$0xff]  ;;  %v88_v9 = vld [vmem:[#allocation5 + $0xb0] sm:$0xff]  ;;  %v87_v10 = vld [vmem:[#allocation5 + $0xa8] sm:$0xff]  ;;  %p489_p1 = scmp.ne.s32.totalorder %s402_s11, %s488_s12  ;;  %p494_p3 = scmp.lt.s32.totalorder %s488_s12, %s488_s12 }
  0x29   :  { %145 = vmatpush1.msra.mxu0 %v94_v3  ;;  %v86_v11 = vld [vmem:[#allocation5 + $0xa0] sm:$0xff]  ;;  %v85_v12 = vld [vmem:[#allocation5 + $0x98] sm:$0xff]  ;;  %v84_v13 = vld [vmem:[#allocation5 + $0x90] sm:$0xff] }
  0x2a   :  { %146 = vmatprep.subr.mxu0 %v93_v4  ;;  %v83_v14 = vld [vmem:[#allocation5 + $0x88] sm:$0xff]  ;;  %v82_v15 = vld [vmem:[#allocation5 + $0x80] sm:$0xff]  ;;  %v81_v16 = vld [vmem:[#allocation5 + $0x78] sm:$0xff]  ;;  %p495_p4 = por %p494_p3, %p493_p2 }
  0x2b   :  { %147 = vmatpush1.msra.mxu0 %v92_v5  ;;  %v80_v17 = vld [vmem:[#allocation5 + $0x70] sm:$0xff]  ;;  %v79_v18 = vld [vmem:[#allocation5 + $0x68] sm:$0xff]  ;;  %v78_v19 = vld [vmem:[#allocation5 + $0x60] sm:$0xff] }
  0x2c   :  { %148 = vmatprep.subr.mxu0 %v91_v6  ;;  %v77_v20 = vld [vmem:[#allocation5 + $0x58] sm:$0xff]  ;;  %v76_v21 = vld [vmem:[#allocation5 + $0x50] sm:$0xff]  ;;  %v75_v22 = vld [vmem:[#allocation5 + $0x48] sm:$0xff]  ;;  %p496_p5 = pnand %p495_p4, %p489_p1 }
  0x2d   :  { %149 = vmatpush1.msra.mxu0 %v90_v7  ;;  %v74_v23 = vld [vmem:[#allocation5 + $0x40] sm:$0xff]  ;;  %v63_v24 = vld [vmem:[#allocation2 + $0x8] sm:$0xff]  ;;  %v73_v25 = vld [vmem:[#allocation5 + $0x38] sm:$0xff] }
  0x2e   :  { %150 = vmatprep.subr.mxu0 %v89_v8  ;;  %v72_v26 = vld [vmem:[#allocation5 + $0x30] sm:$0xff]  ;;  %206 = vmatprep.mubr.f32.mxu0 %v63_v24  ;;  %v270_v27 = vld [vmem:[#allocation7 + $0xf8] sm:$0xff]  ;;  %v268_v29 = vld [vmem:[#allocation7 + $0xe8] sm:$0xff] }
  0x2f   :  { %151 = vmatpush1.msra.mxu0 %v88_v9  ;;  %315 = vmatprep.subr.mxu1 %v270_v27  ;;  %v269_v28 = vld [vmem:[#allocation7 + $0xf0] sm:$0xff]  ;;  %v267_v30 = vld [vmem:[#allocation7 + $0xe0] sm:$0xff]  ;;  %v71_v31 = vld [vmem:[#allocation5 + $0x28] sm:$0xff] }
  0x30   :  { %152 = vmatprep.subr.mxu0 %v87_v10  ;;  %316 = vmatpush1.msra.mxu1 %v269_v28  ;;  %v266_v32 = vld [vmem:[#allocation7 + $0xd8] sm:$0xff]  ;;  %v70_v33 = vld [vmem:[#allocation5 + $0x20] sm:$0xff]  ;;  %v265_v34 = vld [vmem:[#allocation7 + $0xd0] sm:$0xff] }
  0x31   :  { %153 = vmatpush1.msra.mxu0 %v86_v11  ;;  %317 = vmatprep.subr.mxu1 %v268_v29  ;;  %v69_v35 = vld [vmem:[#allocation5 + $0x18] sm:$0xff]  ;;  %v264_v36 = vld [vmem:[#allocation7 + $0xc8] sm:$0xff]  ;;  %v68_v37 = vld [vmem:[#allocation5 + $0x10] sm:$0xff] }
  0x32   :  { %154 = vmatprep.subr.mxu0 %v85_v12  ;;  %318 = vmatpush1.msra.mxu1 %v267_v30  ;;  %v263_v38 = vld [vmem:[#allocation7 + $0xc0] sm:$0xff]  ;;  %v67_v39 = vld [vmem:[#allocation5 + $0x8] sm:$0xff]  ;;  %v262_v40 = vld [vmem:[#allocation7 + $0xb8] sm:$0xff] }
  0x33   :  { %155 = vmatpush1.msra.mxu0 %v84_v13  ;;  %319 = vmatprep.subr.mxu1 %v266_v32  ;;  %v66_v41 = vld [vmem:[#allocation5] sm:$0xff]  ;;  %v261_v42 = vld [vmem:[#allocation7 + $0xb0] sm:$0xff]  ;;  %v129_v43 = vld [vmem:[#allocation5 + $0x1f8] sm:$0xff] }
  0x34   :  { %156 = vmatprep.subr.mxu0 %v83_v14  ;;  %320 = vmatpush1.msra.mxu1 %v265_v34  ;;  %v260_v44 = vld [vmem:[#allocation7 + $0xa8] sm:$0xff]  ;;  %v128_v45 = vld [vmem:[#allocation5 + $0x1f0] sm:$0xff]  ;;  %v259_v46 = vld [vmem:[#allocation7 + $0xa0] sm:$0xff] }
  0x35   :  { %157 = vmatpush1.msra.mxu0 %v82_v15  ;;  %321 = vmatprep.subr.mxu1 %v264_v36  ;;  %v127_v47 = vld [vmem:[#allocation5 + $0x1e8] sm:$0xff]  ;;  %v258_v48 = vld [vmem:[#allocation7 + $0x98] sm:$0xff]  ;;  %v126_v49 = vld [vmem:[#allocation5 + $0x1e0] sm:$0xff] }
  0x36   :  { %158 = vmatprep.subr.mxu0 %v81_v16  ;;  %322 = vmatpush1.msra.mxu1 %v263_v38  ;;  %v257_v50 = vld [vmem:[#allocation7 + $0x90] sm:$0xff]  ;;  %v125_v51 = vld [vmem:[#allocation5 + $0x1d8] sm:$0xff]  ;;  %v256_v52 = vld [vmem:[#allocation7 + $0x88] sm:$0xff] }
  0x37   :  { %159 = vmatpush1.msra.mxu0 %v80_v17  ;;  %323 = vmatprep.subr.mxu1 %v262_v40  ;;  %v124_v53 = vld [vmem:[#allocation5 + $0x1d0] sm:$0xff]  ;;  %v255_v54 = vld [vmem:[#allocation7 + $0x80] sm:$0xff]  ;;  %v123_v55 = vld [vmem:[#allocation5 + $0x1c8] sm:$0xff] }
  0x38   :  { %160 = vmatprep.subr.mxu0 %v79_v18  ;;  %324 = vmatpush1.msra.mxu1 %v261_v42  ;;  %v254_v56 = vld [vmem:[#allocation7 + $0x78] sm:$0xff]  ;;  %v122_v57 = vld [vmem:[#allocation5 + $0x1c0] sm:$0xff]  ;;  %v253_v58 = vld [vmem:[#allocation7 + $0x70] sm:$0xff] }
  0x39   :  { %161 = vmatpush1.msra.mxu0 %v78_v19  ;;  %325 = vmatprep.subr.mxu1 %v260_v44  ;;  %v121_v59 = vld [vmem:[#allocation5 + $0x1b8] sm:$0xff]  ;;  %v252_v60 = vld [vmem:[#allocation7 + $0x68] sm:$0xff]  ;;  %v120_v61 = vld [vmem:[#allocation5 + $0x1b0] sm:$0xff] }
  0x3a   :  { %162 = vmatprep.subr.mxu0 %v77_v20  ;;  %326 = vmatpush1.msra.mxu1 %v259_v46  ;;  %v251_v62 = vld [vmem:[#allocation7 + $0x60] sm:$0xff]  ;;  %v119_v63 = vld [vmem:[#allocation5 + $0x1a8] sm:$0xff]  ;;  %v250_v0 = vld [vmem:[#allocation7 + $0x58] sm:$0xff] }
  0x3b   :  { %163 = vmatpush1.msra.mxu0 %v76_v21  ;;  %327 = vmatprep.subr.mxu1 %v258_v48  ;;  %v118_v1 = vld [vmem:[#allocation5 + $0x1a0] sm:$0xff]  ;;  %v249_v2 = vld [vmem:[#allocation7 + $0x50] sm:$0xff]  ;;  %v117_v3 = vld [vmem:[#allocation5 + $0x198] sm:$0xff] }
  0x3c   :  { %164 = vmatprep.subr.mxu0 %v75_v22  ;;  %328 = vmatpush1.msra.mxu1 %v257_v50  ;;  %v248_v4 = vld [vmem:[#allocation7 + $0x48] sm:$0xff]  ;;  %v116_v5 = vld [vmem:[#allocation5 + $0x190] sm:$0xff]  ;;  %v247_v6 = vld [vmem:[#allocation7 + $0x40] sm:$0xff] }
  0x3d   :  { %165 = vmatpush1.msra.mxu0 %v74_v23  ;;  %329 = vmatprep.subr.mxu1 %v256_v52  ;;  %v115_v7 = vld [vmem:[#allocation5 + $0x188] sm:$0xff]  ;;  %v246_v8 = vld [vmem:[#allocation7 + $0x38] sm:$0xff]  ;;  %v114_v9 = vld [vmem:[#allocation5 + $0x180] sm:$0xff] }
  0x3e   :  { %166 = vmatprep.subr.mxu0 %v73_v25  ;;  %330 = vmatpush1.msra.mxu1 %v255_v54  ;;  %v245_v10 = vld [vmem:[#allocation7 + $0x30] sm:$0xff]  ;;  %v113_v11 = vld [vmem:[#allocation5 + $0x178] sm:$0xff]  ;;  %v244_v12 = vld [vmem:[#allocation7 + $0x28] sm:$0xff] }
  0x3f   :  { %167 = vmatpush1.msra.mxu0 %v72_v26  ;;  %331 = vmatprep.subr.mxu1 %v254_v56  ;;  %v112_v13 = vld [vmem:[#allocation5 + $0x170] sm:$0xff]  ;;  %v243_v14 = vld [vmem:[#allocation7 + $0x20] sm:$0xff]  ;;  %v111_v15 = vld [vmem:[#allocation5 + $0x168] sm:$0xff] }
  0x40   :  { %168 = vmatprep.subr.mxu0 %v71_v31  ;;  %332 = vmatpush1.msra.mxu1 %v253_v58  ;;  %v242_v16 = vld [vmem:[#allocation7 + $0x18] sm:$0xff]  ;;  %v110_v17 = vld [vmem:[#allocation5 + $0x160] sm:$0xff]  ;;  %v241_v18 = vld [vmem:[#allocation7 + $0x10] sm:$0xff] }
  0x41   :  { %169 = vmatpush1.msra.mxu0 %v70_v33  ;;  %333 = vmatprep.subr.mxu1 %v252_v60  ;;  %v109_v19 = vld [vmem:[#allocation5 + $0x158] sm:$0xff]  ;;  %v240_v20 = vld [vmem:[#allocation7 + $0x8] sm:$0xff]  ;;  %v108_v21 = vld [vmem:[#allocation5 + $0x150] sm:$0xff] }
  0x42   :  { %170 = vmatprep.subr.mxu0 %v69_v35  ;;  %334 = vmatpush1.msra.mxu1 %v251_v62  ;;  %v239_v22 = vld [vmem:[#allocation7] sm:$0xff]  ;;  %v107_v23 = vld [vmem:[#allocation5 + $0x148] sm:$0xff]  ;;  %v302_v24 = vld [vmem:[#allocation7 + $0x1f8] sm:$0xff] }
  0x43   :  { %171 = vmatpush1.msra.mxu0 %v68_v37  ;;  %335 = vmatprep.subr.mxu1 %v250_v0  ;;  %v106_v25 = vld [vmem:[#allocation5 + $0x140] sm:$0xff]  ;;  %v301_v26 = vld [vmem:[#allocation7 + $0x1f0] sm:$0xff]  ;;  %v105_v27 = vld [vmem:[#allocation5 + $0x138] sm:$0xff] }
  0x44   :  { %172 = vmatprep.subr.mxu0 %v67_v39  ;;  %336 = vmatpush1.msra.mxu1 %v249_v2  ;;  %v300_v28 = vld [vmem:[#allocation7 + $0x1e8] sm:$0xff]  ;;  %v104_v29 = vld [vmem:[#allocation5 + $0x130] sm:$0xff]  ;;  %v299_v30 = vld [vmem:[#allocation7 + $0x1e0] sm:$0xff] }
  0x45   :  { %173 = vmatpush1.msra.mxu0 %v66_v41  ;;  %337 = vmatprep.subr.mxu1 %v248_v4  ;;  %v103_v31 = vld [vmem:[#allocation5 + $0x128] sm:$0xff]  ;;  %v298_v32 = vld [vmem:[#allocation7 + $0x1d8] sm:$0xff]  ;;  %v102_v33 = vld [vmem:[#allocation5 + $0x120] sm:$0xff]  ;;  %v132_v4 = vlaneseq }
  0x46   :  { %174 = vmatprep.subr.mxu0 %v129_v43  ;;  %338 = vmatpush1.msra.mxu1 %v247_v6  ;;  %v297_v34 = vld [vmem:[#allocation7 + $0x1d0] sm:$0xff]  ;;  %v101_v35 = vld [vmem:[#allocation5 + $0x118] sm:$0xff]  ;;  %v99_v37 = vld [vmem:[#allocation5 + $0x108] sm:$0xff] }
  0x47   :  { %175 = vmatpush2.msra.mxu0 %v128_v45  ;;  %339 = vmatprep.subr.mxu1 %v246_v8  ;;  %v100_v36 = vld [vmem:[#allocation5 + $0x110] sm:$0xff]  ;;  %v98_v38 = vld [vmem:[#allocation5 + $0x100] sm:$0xff]  ;;  %v65_v40 = vld [vmem:[#allocation2 + $0x18] sm:$0xff] }
  0x48   :  { %176 = vmatprep.subr.mxu0 %v127_v47  ;;  %340 = vmatpush1.msra.mxu1 %v245_v10  ;;  %v62_v39 = vld [vmem:[#allocation2] sm:$0xff]  ;;  %v64_v41 = vld [vmem:[#allocation2 + $0x10] sm:$0xff]  ;;  %v296_v42 = vld [vmem:[#allocation7 + $0x1c8] sm:$0xff] }
  0x49   :  { %177 = vmatpush2.msra.mxu0 %v126_v49  ;;  %341 = vmatprep.subr.mxu1 %v244_v12  ;;  %v295_v43 = vld [vmem:[#allocation7 + $0x1c0] sm:$0xff]  ;;  %v294_v44 = vld [vmem:[#allocation7 + $0x1b8] sm:$0xff]  ;;  %v293_v45 = vld [vmem:[#allocation7 + $0x1b0] sm:$0xff] }
  0x4a   :  { %178 = vmatprep.subr.mxu0 %v125_v51  ;;  %342 = vmatpush1.msra.mxu1 %v243_v14  ;;  %v292_v46 = vld [vmem:[#allocation7 + $0x1a8] sm:$0xff]  ;;  %v291_v47 = vld [vmem:[#allocation7 + $0x1a0] sm:$0xff]  ;;  %v290_v48 = vld [vmem:[#allocation7 + $0x198] sm:$0xff] }
  0x4b   :  { %179 = vmatpush2.msra.mxu0 %v124_v53  ;;  %343 = vmatprep.subr.mxu1 %v242_v16  ;;  %v289_v49 = vld [vmem:[#allocation7 + $0x190] sm:$0xff]  ;;  %v288_v50 = vld [vmem:[#allocation7 + $0x188] sm:$0xff]  ;;  %v287_v51 = vld [vmem:[#allocation7 + $0x180] sm:$0xff] }
  0x4c   :  { %180 = vmatprep.subr.mxu0 %v123_v55  ;;  %344 = vmatpush1.msra.mxu1 %v241_v18  ;;  %v286_v52 = vld [vmem:[#allocation7 + $0x178] sm:$0xff]  ;;  %v285_v53 = vld [vmem:[#allocation7 + $0x170] sm:$0xff]  ;;  %v284_v54 = vld [vmem:[#allocation7 + $0x168] sm:$0xff] }
  0x4d   :  { %181 = vmatpush2.msra.mxu0 %v122_v57  ;;  %345 = vmatprep.subr.mxu1 %v240_v20  ;;  %v283_v55 = vld [vmem:[#allocation7 + $0x160] sm:$0xff]  ;;  %v282_v56 = vld [vmem:[#allocation7 + $0x158] sm:$0xff]  ;;  %v281_v57 = vld [vmem:[#allocation7 + $0x150] sm:$0xff] }
  0x4e   :  { %182 = vmatprep.subr.mxu0 %v121_v59  ;;  %346 = vmatpush1.msra.mxu1 %v239_v22  ;;  %v280_v58 = vld [vmem:[#allocation7 + $0x148] sm:$0xff]  ;;  %v279_v59 = vld [vmem:[#allocation7 + $0x140] sm:$0xff]  ;;  %v278_v60 = vld [vmem:[#allocation7 + $0x138] sm:$0xff] }
  0x4f   :  { %183 = vmatpush2.msra.mxu0 %v120_v61  ;;  %347 = vmatprep.subr.mxu1 %v302_v24  ;;  %v277_v61 = vld [vmem:[#allocation7 + $0x130] sm:$0xff]  ;;  %v276_v62 = vld [vmem:[#allocation7 + $0x128] sm:$0xff]  ;;  %v274_v0 = vld [vmem:[#allocation7 + $0x118] sm:$0xff] }
  0x50   :  { %184 = vmatprep.subr.mxu0 %v119_v63  ;;  %348 = vmatpush2.msra.mxu1 %v301_v26  ;;  %v275_v63 = vld [vmem:[#allocation7 + $0x120] sm:$0xff]  ;;  %v272_v2 = vld [vmem:[#allocation7 + $0x108] sm:$0xff] }
  0x51   :  { %185 = vmatpush2.msra.mxu0 %v118_v1  ;;  %349 = vmatprep.subr.mxu1 %v300_v28  ;;  %v273_v1 = vld [vmem:[#allocation7 + $0x110] sm:$0xff] }
  0x52   :  { %186 = vmatprep.subr.mxu0 %v117_v3  ;;  %350 = vmatpush2.msra.mxu1 %v299_v30  ;;  %v271_v3 = vld [vmem:[#allocation7 + $0x100] sm:$0xff] }
  0x53   :  { %187 = vmatpush2.msra.mxu0 %v116_v5  ;;  %351 = vmatprep.subr.mxu1 %v298_v32  ;;  %v133_v5 = vshrl.u32 %v132_v4, 7 }
  0x54   :  { %188 = vmatprep.subr.mxu0 %v115_v7  ;;  %352 = vmatpush2.msra.mxu1 %v297_v34  ;;  %v130_v7 = vld [vmem:[%s582_s2] sm:$0x3] }
  0x55   :  { %189 = vmatpush2.msra.mxu0 %v114_v9  ;;  %353 = vmatprep.subr.mxu1 %v296_v42  ;;  %v134_v6 = vsub.s32 0, %v133_v5  ;;  %v138_v8 = vsub.s32 1, %v133_v5 }
  0x56   :  { %190 = vmatprep.subr.mxu0 %v113_v11  ;;  %354 = vmatpush2.msra.mxu1 %v295_v43 }
  0x57   :  { %191 = vmatpush2.msra.mxu0 %v112_v13  ;;  %355 = vmatprep.subr.mxu1 %v294_v44  ;;  %v135_v9 = vrot.slane %v130_v7, %v134_v6  ;;  %v139_v10 = vrot.slane %v130_v7, %v138_v8 }
  0x58   :  { %192 = vmatprep.subr.mxu0 %v111_v15  ;;  %356 = vmatpush2.msra.mxu1 %v293_v45 }
  0x59   :  { %193 = vmatpush2.msra.mxu0 %v110_v17  ;;  %357 = vmatprep.subr.mxu1 %v292_v46 }
  0x5a   :  { %194 = vmatprep.subr.mxu0 %v109_v19  ;;  %358 = vmatpush2.msra.mxu1 %v291_v47 }
  0x5b   :  { %195 = vmatpush2.msra.mxu0 %v108_v21  ;;  %359 = vmatprep.subr.mxu1 %v290_v48 }
  0x5c   :  { %196 = vmatprep.subr.mxu0 %v107_v23  ;;  %360 = vmatpush2.msra.mxu1 %v289_v49 }
  0x5d   :  { %197 = vmatpush2.msra.mxu0 %v106_v25  ;;  %361 = vmatprep.subr.mxu1 %v288_v50 }
  0x5e   :  { %198 = vmatprep.subr.mxu0 %v105_v27  ;;  %362 = vmatpush2.msra.mxu1 %v287_v51 }
  0x5f   :  { %199 = vmatpush2.msra.mxu0 %v104_v29  ;;  %363 = vmatprep.subr.mxu1 %v286_v52 }
  0x60   :  { %200 = vmatprep.subr.mxu0 %v103_v31  ;;  %364 = vmatpush2.msra.mxu1 %v285_v53 }
  0x61   :  { %201 = vmatpush2.msra.mxu0 %v102_v33  ;;  %365 = vmatprep.subr.mxu1 %v284_v54 }
  0x62   :  { %202 = vmatprep.subr.mxu0 %v101_v35  ;;  %366 = vmatpush2.msra.mxu1 %v283_v55 }
  0x63   :  { %203 = vmatpush2.msra.mxu0 %v100_v36  ;;  %367 = vmatprep.subr.mxu1 %v282_v56 }
  0x64   :  { %204 = vmatprep.subr.mxu0 %v99_v37  ;;  %368 = vmatpush2.msra.mxu1 %v281_v57 }
  0x65   :  { %205 = vmatpush2.msra.mxu0 %v98_v38  ;;  %369 = vmatprep.subr.mxu1 %v280_v58 }
  0x66   :  { %207 = vmatmul.mubr.f32.vlgmr.msra.gmra.mxu0 %v62_v39  ;;  %370 = vmatpush2.msra.mxu1 %v279_v59  ;;  %v303_v39 = vld [vmem:[%s584_s4] sm:$0x3] }
  0x67   :  { %212 = vmatprep.mubr.f32.mxu0 %v65_v40  ;;  %371 = vmatprep.subr.mxu1 %v278_v60  ;;  %v308_v40 = vrot.slane %v303_v39, %v134_v6 }
  0x68   :  { %372 = vmatpush2.msra.mxu1 %v277_v61 }
  0x69   :  { %373 = vmatprep.subr.mxu1 %v276_v62 }
  0x6a   :  { %213 = vmatmul.mubr.f32.gmra.mxu0 %v64_v41  ;;  %374 = vmatpush2.msra.mxu1 %v275_v63  ;;  %v312_v41 = vrot.slane %v303_v39, %v138_v8 }
  0x6b   :  { %375 = vmatprep.subr.mxu1 %v274_v0 }
  0x6c   :  { %376 = vmatpush2.msra.mxu1 %v273_v1 }
  0x6d   :  { %377 = vmatprep.subr.mxu1 %v272_v2 }
  0x6e   :  { %378 = vmatpush2.msra.mxu1 %v271_v3 }
 0x126   :  { %v208_v11 = vpop.f32.mrf.mxu0 }
 0x127   :  { %v209_v12 = vadd.f32 %v208_v11, %v135_v9 }
 0x128   :  { %v210_v13 = vpop.f32.mrf.mxu0 }
 0x129   :  { %v223_v14 = vmul.f32 0.70710677, %v209_v12  ;;  %v211_v15 = vadd.f32 %v210_v13, %v139_v10  ;;  %v219_v29 = vmul.f32 0.5, %v209_v12 }
 0x12a   :  { %v214_v16 = vpop.f32.mrf.mxu0 }
 0x12b   :  { %420 = verf.f32 %v223_v14  ;;  %v224_v17 = vmul.f32 0.70710677, %v211_v15  ;;  %v215_v18 = vadd.f32 %v214_v16, %v135_v9  ;;  %v220_v26 = vmul.f32 0.5, %v211_v15 }
 0x12c   :  { %v216_v19 = vpop.f32.mrf.mxu0 }
 0x12d   :  { %422 = verf.f32 %v224_v17  ;;  %v225_v20 = vmul.f32 0.70710677, %v215_v18  ;;  %v217_v21 = vadd.f32 %v216_v19, %v139_v10  ;;  %v221_v36 = vmul.f32 0.5, %v215_v18 }
 0x12f   :  { %424 = verf.f32 %v225_v20  ;;  %v226_v22 = vmul.f32 0.70710677, %v217_v21  ;;  %v222_v34 = vmul.f32 0.5, %v217_v21 }
 0x131   :  { %426 = verf.f32 %v226_v22 }
 0x138   :  { %v421_v23 = vpop.eup %420 }
 0x139   :  { %v231_v25 = vadd.f32 1.0, %v421_v23 }
 0x13a   :  { %v423_v24 = vpop.eup %422 }
 0x13b   :  { %v232_v27 = vadd.f32 1.0, %v423_v24  ;;  %v235_v32 = vmul.f32 %v231_v25, %v219_v29 }
 0x13c   :  { %v425_v28 = vpop.eup %424 }
 0x13d   :  { %v236_v30 = vmul.f32 %v232_v27, %v220_v26  ;;  %v233_v33 = vadd.f32 1.0, %v425_v28 }
 0x13e   :  { %v427_v31 = vpop.eup %426 }
 0x13f   :  { %379 = vmatprep.mubr.f32.mxu1 %v236_v30  ;;  %v234_v35 = vadd.f32 1.0, %v427_v31  ;;  %v237_v38 = vmul.f32 %v233_v33, %v221_v36 }
 0x140   :  { %380 = vmatmul.mubr.f32.vlgmr.msra.gmra.mxu1 %v235_v32 }
 0x141   :  { %v238_v37 = vmul.f32 %v234_v35, %v222_v34 }
 0x143   :  { %385 = vmatprep.mubr.f32.mxu1 %v238_v37 }
 0x144   :  { %386 = vmatmul.mubr.f32.gmra.mxu1 %v237_v38 }
 0x200   :  { %v381_v42 = vpop.f32.mrf.mxu1 }
 0x201   :  { %v382_v43 = vadd.f32 %v381_v42, %v308_v40 }
 0x202   :  { %v383_v44 = vpop.f32.mrf.mxu1 }
 0x203   :  { %392 = vst [vmem:[#allocation8] sm:$0xff] %v382_v43  ;;  %v384_v45 = vadd.f32 %v383_v44, %v312_v41 }
 0x204   :  { %v387_v46 = vpop.f32.mrf.mxu1 }
 0x205   :  { %393 = vst [vmem:[#allocation8 + $0x8] sm:$0xff] %v384_v45  ;;  %v388_v47 = vadd.f32 %v387_v46, %v308_v40 }
 0x206   :  { %v389_v48 = vpop.f32.mrf.mxu1 }
 0x207   :  { %394 = vst [vmem:[#allocation8 + $0x10] sm:$0xff] %v388_v47  ;;  %v390_v49 = vadd.f32 %v389_v48, %v312_v41 }
 0x209   :  { %395 = vst [vmem:[#allocation8 + $0x18] sm:$0xff] %v390_v49 }
 0x20a   :  { %499 = shalt.err (!%p496_p5)
}
 0x20b   :  { %407 = dma.vmem_to_hbm [thread:$0]  %s402_s11, 512, %s585_s5, [#allocation4], %s516_s23, %s516_s23, %s517_s24  }
 0x20c   :  { %512 = dma.done.wait [#allocation4], 512  }
 0x20d   :  { %513 = vsyncadd [#allocation4], 4294966784 }
 0x20e   :  { %411 = vsyncpa [#allocation3], 1 }
 0x20f   :  { %412 = vsyncpa [#allocation6], 1 }
 0x210   :  { %413 = vsyncpa [#allocation4], 1 }

</bundles_post_ra>
